<compile_context>
chip_gen: v5e
topology: v5e:2x2
jax: 0.10.0
libtpu: 0.0.40
codegen_flags: <defaults>
</compile_context>

<pallas_src>
import functools

import jax
import jax.numpy as jnp
from jax.experimental import pallas as pl
from jax.experimental.pallas import tpu as pltpu


def _mlp_kernel(x_ref, wu_ref, bu_ref, wd_ref, bd_ref, o_ref, acc_ref):
    # x_ref: (tm, dim)   wu_ref: (dim, tk)   bu_ref: (1, tk)
    # wd_ref: (tk, dim)  bd_ref: (1, dim)    o_ref: (tm, dim)  acc_ref: (tm, dim) f32
    k = pl.program_id(1)

    @pl.when(k == 0)
    def _():
        acc_ref[...] = jnp.zeros_like(acc_ref)

    # Up projection for this hidden-column tile (MXU, f32 accumulation).
    h = jnp.dot(x_ref[...], wu_ref[...], preferred_element_type=jnp.float32)
    h = h + bu_ref[...].astype(jnp.float32)
    # SiLU: h * sigmoid(h) (sigmoid -> EUP, math kept in f32).
    h = h * jax.nn.sigmoid(h)

    # Down projection partial sum for this hidden tile.
    acc_ref[...] += jnp.dot(h.astype(wd_ref.dtype), wd_ref[...],
                            preferred_element_type=jnp.float32)

    # Finalize: add the down bias once and store (lane-dense (tm, dim) tile).
    @pl.when(k == pl.num_programs(1) - 1)
    def _():
        o_ref[...] = (acc_ref[...] + bd_ref[...].astype(jnp.float32)
                      ).astype(o_ref.dtype)


def _round_up(n, m):
    return ((n + m - 1) // m) * m


def _hw_defaults():
    """Generation-aware (tm, tk, vmem_limit_bytes).

    Weight HBM traffic ~= (M/tm) * 2 * dim * hidden * bytes, so tm sets the
    FLOPs/weight-byte ratio: tm~768 is needed on v6e to be MXU-bound; v7x has
    only 64 MiB VMEM per TC so we stop at tm=512 (~40 MiB double-buffered).
    """
    vmem_cap = None
    try:
        vmem_cap = int(getattr(pltpu.get_tpu_info(), "vmem_capacity_bytes", 0)) or None
    except Exception:
        vmem_cap = None
    if vmem_cap is None:
        try:
            kind = jax.devices()[0].device_kind.lower()
            vmem_cap = 64 * 1024 * 1024 if "v7" in kind else 128 * 1024 * 1024
        except Exception:
            vmem_cap = 128 * 1024 * 1024

    if vmem_cap <= 64 * 1024 * 1024:
        # v7x-class: 64 MiB VMEM per TensorCore.
        return 512, 512, 56 * 1024 * 1024
    # v5e / v6e-class: 128 MiB VMEM.
    return 768, 512, 100 * 1024 * 1024


@functools.partial(jax.jit, static_argnames=("tm", "tk", "vmem_limit_bytes"))
def _mlp_forward_impl(x, w_up_t, b_up, w_down_t, b_down, *, tm, tk,
                      vmem_limit_bytes):
    B, S, dim = x.shape
    hidden = w_up_t.shape[1]
    M = B * S
    x2d = x.reshape(M, dim)

    # dtype-aware sublane granularity for the row dimension of x/out/acc tiles.
    sub = {4: 8, 2: 16, 1: 32}.get(x.dtype.itemsize, 8)

    # Effective tiles, never exceeding the padded extents.
    tm_eff = max(sub, min(tm, _round_up(M, sub)))
    tm_eff = _round_up(tm_eff, sub)
    m_pad = _round_up(M, tm_eff)

    tk_eff = max(128, min(tk, _round_up(hidden, 128)))
    tk_eff = _round_up(tk_eff, 128)
    hidden_pad = _round_up(hidden, tk_eff)

    dim_pad = _round_up(dim, 128)

    # Zero-pad operands (zeros are exact no-ops through this MLP: padded hidden
    # columns give silu(0)=0 which contributes nothing to the down projection,
    # padded dim output columns / padded rows are sliced away below).
    if m_pad != M or dim_pad != dim:
        x2d = jnp.pad(x2d, ((0, m_pad - M), (0, dim_pad - dim)))
    if dim_pad != dim or hidden_pad != hidden:
        w_up_t = jnp.pad(w_up_t, ((0, dim_pad - dim), (0, hidden_pad - hidden)))
        w_down_t = jnp.pad(w_down_t,
                           ((0, hidden_pad - hidden), (0, dim_pad - dim)))
    if hidden_pad != hidden:
        b_up = jnp.pad(b_up, ((0, 0), (0, hidden_pad - hidden)))
    if dim_pad != dim:
        b_down = jnp.pad(b_down, ((0, 0), (0, dim_pad - dim)))

    grid = (m_pad // tm_eff, hidden_pad // tk_eff)

    # Advisory cost estimate; weights (and biases) are re-streamed once per row
    # tile, so multiply by grid[0].
    itemsize = x.dtype.itemsize
    w_bytes = (w_up_t.size * w_up_t.dtype.itemsize
               + w_down_t.size * w_down_t.dtype.itemsize
               + b_up.size * b_up.dtype.itemsize
               + b_down.size * b_down.dtype.itemsize)
    flops = 4 * m_pad * dim_pad * hidden_pad + 4 * m_pad * hidden_pad
    transcendentals = m_pad * hidden_pad
    bytes_accessed = (grid[0] * w_bytes
                      + x2d.size * itemsize
                      + m_pad * dim_pad * itemsize)

    out2d = pl.pallas_call(
        _mlp_kernel,
        out_shape=jax.ShapeDtypeStruct((m_pad, dim_pad), x.dtype),
        grid_spec=pltpu.PrefetchScalarGridSpec(
            num_scalar_prefetch=0,
            grid=grid,
            in_specs=[
                pl.BlockSpec((tm_eff, dim_pad), lambda i, k: (i, 0)),   # x row tile (no re-DMA over k)
                pl.BlockSpec((dim_pad, tk_eff), lambda i, k: (0, k)),   # Wu column tile
                pl.BlockSpec((1, tk_eff), lambda i, k: (0, k)),         # up bias tile
                pl.BlockSpec((tk_eff, dim_pad), lambda i, k: (k, 0)),   # Wd row tile
                pl.BlockSpec((1, dim_pad), lambda i, k: (0, 0)),        # down bias
            ],
            out_specs=pl.BlockSpec((tm_eff, dim_pad), lambda i, k: (i, 0)),
            scratch_shapes=[pltpu.VMEM((tm_eff, dim_pad), jnp.float32)],
        ),
        compiler_params=pltpu.CompilerParams(
            dimension_semantics=("parallel", "arbitrary"),
            vmem_limit_bytes=vmem_limit_bytes),
        cost_estimate=pl.CostEstimate(
            flops=flops,
            transcendentals=transcendentals,
            bytes_accessed=bytes_accessed),
    )(x2d, w_up_t, b_up, w_down_t, b_down)

    return out2d[:M, :dim].reshape(B, S, dim)


def mlp_forward(x, w_up_t, b_up, w_down_t, b_down, *, tm=None, tk=None,
                vmem_limit_bytes=None):
    """x: (B, S, dim) -> (B, S, dim). Weights pre-transposed to (in, out).

    For production, pass bf16 x / w_up_t / w_down_t (accumulation stays f32
    in-kernel); f32 operands halve MXU throughput and double weight DMA.
    """
    d_tm, d_tk, d_vmem = _hw_defaults()
    tm = d_tm if tm is None else tm
    tk = d_tk if tk is None else tk
    vmem_limit_bytes = d_vmem if vmem_limit_bytes is None else vmem_limit_bytes
    return _mlp_forward_impl(x, w_up_t, b_up, w_down_t, b_down,
                             tm=int(tm), tk=int(tk),
                             vmem_limit_bytes=int(vmem_limit_bytes))


def make_params(key, dim, hidden_dim=None, multiple_of=4):
    """Deterministic synthetic params mirroring MLP.__init__ / reset_parameters."""
    if hidden_dim is None:
        hidden_dim = 4 * dim
        hidden_dim = int(2 * hidden_dim / 3)
        hidden_dim = multiple_of * ((hidden_dim + multiple_of - 1) // multiple_of)

    k1, k2, k3, k4 = jax.random.split(key, 4)
    in_std = dim ** (-0.5)
    out_std = hidden_dim ** (-0.5)

    # torch.nn.Linear weights are (out_features, in_features); build in that
    # convention (trunc-normal, as in reset_parameters) then transpose to (in, out).
    w_up = in_std * jax.random.truncated_normal(
        k1, -3.0, 3.0, (hidden_dim, dim), jnp.float32)
    w_down = out_std * jax.random.truncated_normal(
        k2, -3.0, 3.0, (dim, hidden_dim), jnp.float32)
    b_up = 0.1 * jax.random.normal(k3, (1, hidden_dim), jnp.float32)
    b_down = 0.1 * jax.random.normal(k4, (1, dim), jnp.float32)

    return w_up.T, b_up, w_down.T, b_down, hidden_dim


def _reference(x, w_up_t, b_up, w_down_t, b_down):
    h = x @ w_up_t + b_up[0]
    h = h * jax.nn.sigmoid(h)
    return h @ w_down_t + b_down[0]


if __name__ == "__main__":
    # dim=128; the module's default multiple_of=4 gives hidden=344, which is
    # NOT a multiple of 128 -> exercises the padding path.  S=7 -> M=14
    # exercises row padding.  tk=128 forces a 3-step hidden reduction so the
    # accumulator init/finalize path is exercised.
    B, S, dim = 2, 7, 128
    key = jax.random.PRNGKey(0)
    kx, kp = jax.random.split(key)

    x = jax.random.normal(kx, (B, S, dim), jnp.float32)
    w_up_t, b_up, w_down_t, b_down, hidden_dim = make_params(kp, dim, multiple_of=4)

    ref = _reference(x, w_up_t, b_up, w_down_t, b_down)

    # f32 operand path.
    out = mlp_forward(x, w_up_t, b_up, w_down_t, b_down, tk=128)
    out = jax.block_until_ready(out)
    assert out.shape == (B, S, dim)
    assert jnp.allclose(out, ref, atol=2e-2, rtol=2e-2), (
        float(jnp.max(jnp.abs(out - ref))))

    # bf16 operand path (production recommendation); f32 accumulation in-kernel.
    out_bf = mlp_forward(x.astype(jnp.bfloat16),
                         w_up_t.astype(jnp.bfloat16), b_up,
                         w_down_t.astype(jnp.bfloat16), b_down, tk=128)
    out_bf = jax.block_until_ready(out_bf)
    assert out_bf.shape == (B, S, dim)
    assert jnp.allclose(out_bf.astype(jnp.float32), ref, atol=1e-1, rtol=1e-1), (
        float(jnp.max(jnp.abs(out_bf.astype(jnp.float32) - ref))))

    # TODO(synk): dropout (module's optional nn.Dropout) is identity here
    # (dropout=None); a training-mode dropout would use pltpu.prng_* in-kernel.
    print("KERNEL_OK")
</pallas_src>

<mosaic_0001>
module attributes {stable_mosaic.version = 11 : i64} {
  func.func @_mlp_kernel(%arg0: i32, %arg1: i32, %arg2: memref<16x128xf32, #tpu.memory_space<vmem>>, %arg3: memref<128x128xf32, #tpu.memory_space<vmem>>, %arg4: memref<1x128xf32, #tpu.memory_space<vmem>>, %arg5: memref<128x128xf32, #tpu.memory_space<vmem>>, %arg6: memref<1x128xf32, #tpu.memory_space<vmem>>, %arg7: memref<16x128xf32, #tpu.memory_space<vmem>>, %arg8: memref<16x128xf32, #tpu.memory_space<vmem>>) attributes {dimension_semantics = [#tpu.dimension_semantics<parallel>, #tpu.dimension_semantics<arbitrary>], iteration_bounds = array<i64: 1, 3>, scalar_prefetch = 0 : i64, scratch_operands = 1 : i64, tpu.core_type = #tpu.core_type<tc>, window_params = [{transform_indices = @transform_0, window_bounds = array<i64: 16, 128>}, {transform_indices = @transform_1, window_bounds = array<i64: 128, 128>}, {transform_indices = @transform_2, window_bounds = array<i64: 1, 128>}, {transform_indices = @transform_3, window_bounds = array<i64: 128, 128>}, {pipeline_mode = #tpu.pipeline_mode<synchronous>, transform_indices = @transform_4, window_bounds = array<i64: 1, 128>}, {transform_indices = @transform_5, window_bounds = array<i64: 16, 128>}]} {
    %c0_i32 = arith.constant 0 : i32
    %0 = arith.cmpi eq, %arg1, %c0_i32 : i32
    %1 = arith.extui %0 : i1 to i32
    %c0_i32_0 = arith.constant 0 : i32
    %2 = arith.cmpi ne, %1, %c0_i32_0 : i32
    scf.if %2 {
      %cst_15 = arith.constant 0.000000e+00 : f32
      %23 = vector.broadcast %cst_15 : f32 to vector<16x128xf32>
      %c0_16 = arith.constant 0 : index
      %c0_17 = arith.constant 0 : index
      %24 = vector.load %arg8[%c0_16, %c0_17] : memref<16x128xf32, #tpu.memory_space<vmem>>, vector<16x128xf32>
      tpu.vector_store %arg8[%c0_16, %c0_17], %23 {strides = array<i32>} : memref<16x128xf32, #tpu.memory_space<vmem>>, vector<16x128xf32>,
    } else {
    }
    %c0 = arith.constant 0 : index
    %c0_1 = arith.constant 0 : index
    %3 = vector.load %arg2[%c0, %c0_1] : memref<16x128xf32, #tpu.memory_space<vmem>>, vector<16x128xf32>
    %c0_2 = arith.constant 0 : index
    %c0_3 = arith.constant 0 : index
    %4 = vector.load %arg3[%c0_2, %c0_3] : memref<128x128xf32, #tpu.memory_space<vmem>>, vector<128x128xf32>
    %cst = arith.constant dense<0.000000e+00> : vector<16x128xf32>
    %5 = tpu.matmul %3, %4, %cst {dimension_numbers = #tpu.dot_dimension_numbers<[1], [0], [0], [1], [0, 0, 1, 1], [], []>} : vector<16x128xf32>, vector<128x128xf32>, vector<16x128xf32> -> vector<16x128xf32>
    %c0_4 = arith.constant 0 : index
    %c0_5 = arith.constant 0 : index
    %6 = vector.load %arg4[%c0_4, %c0_5] : memref<1x128xf32, #tpu.memory_space<vmem>>, vector<1x128xf32>
    %7 = vector.broadcast %6 : vector<1x128xf32> to vector<16x128xf32>
    %8 = arith.addf %5, %7 : vector<16x128xf32>
    %9 = arith.negf %8 : vector<16x128xf32>
    %10 = math.exp %9 : vector<16x128xf32>
    %cst_6 = arith.constant 1.000000e+00 : f32
    %11 = vector.broadcast %cst_6 : f32 to vector<16x128xf32>
    %12 = arith.addf %11, %10 : vector<16x128xf32>
    %13 = arith.divf %11, %12 : vector<16x128xf32>
    %14 = arith.mulf %8, %13 : vector<16x128xf32>
    %c0_7 = arith.constant 0 : index
    %c0_8 = arith.constant 0 : index
    %15 = vector.load %arg8[%c0_7, %c0_8] : memref<16x128xf32, #tpu.memory_space<vmem>>, vector<16x128xf32>
    %c0_9 = arith.constant 0 : index
    %c0_10 = arith.constant 0 : index
    %16 = vector.load %arg5[%c0_9, %c0_10] : memref<128x128xf32, #tpu.memory_space<vmem>>, vector<128x128xf32>
    %cst_11 = arith.constant dense<0.000000e+00> : vector<16x128xf32>
    %17 = tpu.matmul %14, %16, %cst_11 {dimension_numbers = #tpu.dot_dimension_numbers<[1], [0], [0], [1], [0, 0, 1, 1], [], []>} : vector<16x128xf32>, vector<128x128xf32>, vector<16x128xf32> -> vector<16x128xf32>
    %18 = arith.addf %15, %17 : vector<16x128xf32>
    %c0_12 = arith.constant 0 : index
    %c0_13 = arith.constant 0 : index
    %19 = vector.load %arg8[%c0_12, %c0_13] : memref<16x128xf32, #tpu.memory_space<vmem>>, vector<16x128xf32>
    tpu.vector_store %arg8[%c0_12, %c0_13], %18 {strides = array<i32>} : memref<16x128xf32, #tpu.memory_space<vmem>>, vector<16x128xf32>,
    %c2_i32 = arith.constant 2 : i32
    %20 = arith.cmpi eq, %arg1, %c2_i32 : i32
    %21 = arith.extui %20 : i1 to i32
    %c0_i32_14 = arith.constant 0 : i32
    %22 = arith.cmpi ne, %21, %c0_i32_14 : i32
    scf.if %22 {
      %c0_15 = arith.constant 0 : index
      %c0_16 = arith.constant 0 : index
      %23 = vector.load %arg8[%c0_15, %c0_16] : memref<16x128xf32, #tpu.memory_space<vmem>>, vector<16x128xf32>
      %c0_17 = arith.constant 0 : index
      %c0_18 = arith.constant 0 : index
      %24 = vector.load %arg6[%c0_17, %c0_18] : memref<1x128xf32, #tpu.memory_space<vmem>>, vector<1x128xf32>
      %25 = vector.broadcast %24 : vector<1x128xf32> to vector<16x128xf32>
      %26 = arith.addf %23, %25 : vector<16x128xf32>
      %c0_19 = arith.constant 0 : index
      %c0_20 = arith.constant 0 : index
      %27 = vector.load %arg7[%c0_19, %c0_20] : memref<16x128xf32, #tpu.memory_space<vmem>>, vector<16x128xf32>
      tpu.vector_store %arg7[%c0_19, %c0_20], %26 {strides = array<i32>} : memref<16x128xf32, #tpu.memory_space<vmem>>, vector<16x128xf32>,
    } else {
    }
    return
  }
  func.func @transform_0(%arg0: i32, %arg1: i32) -> (i32, i32) {
    %c0_i32 = arith.constant 0 : i32
    %c0_i32_0 = arith.constant 0 : i32
    return %arg0, %c0_i32 : i32, i32
  }
  func.func @transform_1(%arg0: i32, %arg1: i32) -> (i32, i32) {
    %c0_i32 = arith.constant 0 : i32
    %c0_i32_0 = arith.constant 0 : i32
    return %c0_i32, %arg1 : i32, i32
  }
  func.func @transform_2(%arg0: i32, %arg1: i32) -> (i32, i32) {
    %c0_i32 = arith.constant 0 : i32
    %c0_i32_0 = arith.constant 0 : i32
    return %c0_i32, %arg1 : i32, i32
  }
  func.func @transform_3(%arg0: i32, %arg1: i32) -> (i32, i32) {
    %c0_i32 = arith.constant 0 : i32
    %c0_i32_0 = arith.constant 0 : i32
    return %arg1, %c0_i32 : i32, i32
  }
  func.func @transform_4(%arg0: i32, %arg1: i32) -> (i32, i32) {
    %c0_i32 = arith.constant 0 : i32
    %c0_i32_0 = arith.constant 0 : i32
    %c0_i32_1 = arith.constant 0 : i32
    return %c0_i32, %c0_i32_0 : i32, i32
  }
  func.func @transform_5(%arg0: i32, %arg1: i32) -> (i32, i32) {
    %c0_i32 = arith.constant 0 : i32
    %c0_i32_0 = arith.constant 0 : i32
    return %arg0, %c0_i32 : i32, i32
  }
}

</mosaic_0001>

<bundles_post_ra>
// kernel: _mlp_forward_impl.1
= control target key start
LH: loop header
LB: loop body
LE: loop exit
PB: predicated region body
PF: predicated region fallthrough
CT: control target
= control target key end

     0   :  { %s817_s18 = smov 0   ;;  %s819_s19 = smov 0   ;;  %s966_s0 = inlined_call_operand.vmem [shape: f32[16,128], index: 0, kind: input, shape index: {}]   ;;  %s967_s1 = inlined_call_operand.vmem [shape: f32[128,384], index: 1, kind: input, shape index: {}]   ;;  %s968_s2 = inlined_call_operand.vmem [shape: f32[1,384], index: 2, kind: input, shape index: {}]   ;;  %s969_s3 = inlined_call_operand.vmem [shape: f32[384,128], index: 3, kind: input, shape index: {}]   ;;  %s970_s4 = inlined_call_operand.vmem [shape: f32[1,128], index: 4, kind: input, shape index: {}]   ;;  %s971_s5 = inlined_call_operand.vmem [shape: f32[16,128], index: 5, kind: output, shape index: {}]  }
   0x1   :  { %s821_s20 = smov 0   ;;  %s823_s21 = smov 0  }
   0x2   :  { %s825_s22 = smov 0  }
   0x3 LB: > { %s24_s23 = sadd.s32 1, %s780_s21  ;;  %p67_p1 = scmp.ne.s32.totalorder %s772_s19, %s768_s18  ;;  %s784_s22 = sphi %s825_s22, %s15_s22   ;;  %s780_s21 = sphi %s823_s21, %s975_s21   ;;  %s776_s20 = sphi %s821_s20, %s974_s20   ;;  %s772_s19 = sphi %s819_s19, %s973_s19   ;;  %s768_s18 = sphi %s817_s18, %s972_s18  }
   0x4   : > { %p25_p0 = scmp.ge.s32.totalorder %s24_s23, 3  ;;  %p68_p2 = scmp.eq.s32.totalorder %s784_s22, 0 }
   0x5   : > { %s60_s25 = sadd.s32 1, %s772_s19  ;;  %p648_p5 = scmp.ge.s32.totalorder %s784_s22, 3 }
   0x6   : > { %s977_s23 = smov (%p25_p0, %s24_s23), 0  ;;  %p69_p3 = por %p68_p2, %p67_p1 }
   0x7   : > { %s57_s24 = ssub.s32 %s780_s21, %s977_s23  ;;  %204 = sbr.rel (%p648_p5) target bundleno = 32 (0x20), region = 24 }
   0x8   : > { %p58_p4 = scmp.eq.s32.totalorder %s57_s24, 0 }
   0xa   : > { %s852_s26 = scalar_select %p58_p4, %s772_s19, %s60_s25  }
   0xc   : > { %207 = sbr.rel (!%p69_p3) target bundleno = 32 (0x20), region = 28  ;;  %s209_s27 = sand.u32 (%p69_p3), 1, %s772_s19  }
   0xd   : > { %s650_s28 = sshll.u32 (%p69_p3), %s780_s21, 3  ;;  %s649_s29 = sshll.u32 (%p69_p3), %s209_s27, 7 }
   0xe   : > { %s860_s7 = scalar_lea.vmem (%p69_p3), %s967_s1, %s650_s28  ;;  %s211_s8 = scalar_lea.vmem (%p69_p3), [#allocation3], %s649_s29 }
   0xf   : > { %v272_v0 = vld [vmem:[%s860_s7] sm:$0xff] (%p69_p3)  ;;  %v274_v1 = vld [vmem:[%s860_s7 + $0x18] sm:$0xff] (%p69_p3)  ;;  %v276_v2 = vld [vmem:[%s860_s7 + $0x30] sm:$0xff] (%p69_p3) }
  0x10   : > { %273 = vst [vmem:[%s211_s8] sm:$0xff] (%p69_p3), %v272_v0  ;;  %v278_v3 = vld [vmem:[%s860_s7 + $0x48] sm:$0xff] (%p69_p3)  ;;  %v280_v4 = vld [vmem:[%s860_s7 + $0x60] sm:$0xff] (%p69_p3)  ;;  %v282_v5 = vld [vmem:[%s860_s7 + $0x78] sm:$0xff] (%p69_p3) }
  0x11   : > { %275 = vst [vmem:[%s211_s8 + $0x8] sm:$0xff] %v274_v1  ;;  %v284_v6 = vld [vmem:[%s860_s7 + $0x90] sm:$0xff]  ;;  %v286_v7 = vld [vmem:[%s860_s7 + $0xa8] sm:$0xff]  ;;  %v288_v8 = vld [vmem:[%s860_s7 + $0xc0] sm:$0xff] }
  0x12   : > { %277 = vst [vmem:[%s211_s8 + $0x10] sm:$0xff] %v276_v2  ;;  %v290_v9 = vld [vmem:[%s860_s7 + $0xd8] sm:$0xff]  ;;  %v292_v10 = vld [vmem:[%s860_s7 + $0xf0] sm:$0xff]  ;;  %v294_v11 = vld [vmem:[%s860_s7 + $0x108] sm:$0xff] }
  0x13   : > { %279 = vst [vmem:[%s211_s8 + $0x18] sm:$0xff] %v278_v3  ;;  %v296_v12 = vld [vmem:[%s860_s7 + $0x120] sm:$0xff]  ;;  %v298_v13 = vld [vmem:[%s860_s7 + $0x138] sm:$0xff]  ;;  %v300_v14 = vld [vmem:[%s860_s7 + $0x150] sm:$0xff] }
  0x14   : > { %281 = vst [vmem:[%s211_s8 + $0x20] sm:$0xff] %v280_v4  ;;  %v302_v15 = vld [vmem:[%s860_s7 + $0x168] sm:$0xff] }
  0x15   : > { %283 = vst [vmem:[%s211_s8 + $0x28] sm:$0xff] %v282_v5 }
  0x16   : > { %285 = vst [vmem:[%s211_s8 + $0x30] sm:$0xff] %v284_v6 }
  0x17   : > { %287 = vst [vmem:[%s211_s8 + $0x38] sm:$0xff] %v286_v7 }
  0x18   : > { %289 = vst [vmem:[%s211_s8 + $0x40] sm:$0xff] %v288_v8 }
  0x19   : > { %291 = vst [vmem:[%s211_s8 + $0x48] sm:$0xff] %v290_v9 }
  0x1a   : > { %293 = vst [vmem:[%s211_s8 + $0x50] sm:$0xff] %v292_v10 }
  0x1b   : > { %295 = vst [vmem:[%s211_s8 + $0x58] sm:$0xff] %v294_v11 }
  0x1c   : > { %297 = vst [vmem:[%s211_s8 + $0x60] sm:$0xff] %v296_v12 }
  0x1d   : > { %299 = vst [vmem:[%s211_s8 + $0x68] sm:$0xff] %v298_v13 }
  0x1e   : > { %301 = vst [vmem:[%s211_s8 + $0x70] sm:$0xff] %v300_v14 }
  0x1f   : > { %303 = vst [vmem:[%s211_s8 + $0x78] sm:$0xff] %v302_v15 }
  0x20 PF: > { %p651_p6 = scmp.ge.s32.totalorder %s784_s22, 1  ;;  %p323_p7 = scmp.lt.s32.totalorder %s784_s22, 4 }
  0x22   : > { %p324_p8 = pnand %p651_p6, %p323_p7 }
  0x23   : > { %s330_s9 = sand.u32 (!%p324_p8), 1, %s768_s18   ;;  %p376_p9 = scmp.lt.s32.totalorder (!%p324_p8), %s776_s20, 2 }
  0x24   : > { %327 = sbr.rel (%p324_p8) target bundleno = 391 (0x187), region = 74  ;;  %s652_s10 = sshll.u32 (!%p324_p8), %s330_s9, 7 }
  0x25   : > { %s653_s11 = sshll.u32 (!%p324_p8), %s776_s20, 4  ;;  %s895_s27 = scalar_lea.vmem (!%p324_p8), [#allocation3], %s652_s10 }
  0x26   : > { %p380_p10 = scmp.lt.s32.totalorder (!%p324_p8), %s653_s11, 47  ;;  %p655_p11 = scmp.ne.s32.totalorder (!%p324_p8), %s776_s20, 0 }
  0x29   : > { %s884_s12 = scalar_select %p376_p9, %s776_s20, 2 }
  0x2a   : > { %s979_s11 = smov (!%p380_p10, %s653_s11), 47  ;;  %394 = sbr.rel (%p655_p11) target bundleno = 50 (0x32), region = 82 }
  0x2b   : > { %s378_s15 = scalar_lea.vmem %s968_s2, %s884_s12  ;;  %s654_s16 = sshll.u32 %s979_s11, 3 }
  0x2c   : > { %s893_s25 = scalar_lea.vmem %s969_s3, %s654_s16 }
  0x2f   : > { %v786_v16 = vmov 0.0  }
  0x30   : > { %395 = vst [vmem:[#allocation2] sm:$0xff] %v786_v16 }
  0x31   : > { %396 = vst [vmem:[#allocation2 + $0x8] sm:$0xff] %v786_v16 }
  0x32 PF: > { %v414_v17 = vld [vmem:[%s895_s27 + $0x78] sm:$0xff]  ;;  %v413_v18 = vld [vmem:[%s895_s27 + $0x70] sm:$0xff]  ;;  %v412_v19 = vld [vmem:[%s895_s27 + $0x68] sm:$0xff]  ;;  %p658_p12 = scmp.ne.s32.totalorder %s776_s20, 2 }
  0x33   : > { %419 = vmatpush.msra.mxu0 %v414_v17  ;;  %663 = vmatpush.msra.mxu2 %v414_v17  ;;  %v411_v20 = vld [vmem:[%s895_s27 + $0x60] sm:$0xff]  ;;  %v410_v21 = vld [vmem:[%s895_s27 + $0x58] sm:$0xff]  ;;  %v409_v22 = vld [vmem:[%s895_s27 + $0x50] sm:$0xff] }
  0x34   : > { %v408_v23 = vld [vmem:[%s895_s27 + $0x48] sm:$0xff]  ;;  %v407_v24 = vld [vmem:[%s895_s27 + $0x40] sm:$0xff]  ;;  %v406_v25 = vld [vmem:[%s895_s27 + $0x38] sm:$0xff] }
  0x35   : > { %420 = vmatpush.msra.mxu0 %v413_v18  ;;  %664 = vmatpush.msra.mxu2 %v413_v18  ;;  %v405_v26 = vld [vmem:[%s895_s27 + $0x30] sm:$0xff]  ;;  %v404_v27 = vld [vmem:[%s895_s27 + $0x28] sm:$0xff]  ;;  %v403_v28 = vld [vmem:[%s895_s27 + $0x20] sm:$0xff] }
  0x36   : > { %v402_v29 = vld [vmem:[%s895_s27 + $0x18] sm:$0xff]  ;;  %v401_v30 = vld [vmem:[%s895_s27 + $0x10] sm:$0xff]  ;;  %v400_v31 = vld [vmem:[%s895_s27 + $0x8] sm:$0xff] }
  0x37   : > { %421 = vmatpush.msra.mxu0 %v412_v19  ;;  %665 = vmatpush.msra.mxu2 %v412_v19  ;;  %v399_v32 = vld [vmem:[%s895_s27] sm:$0xff]  ;;  %v397_v33 = vld [vmem:[%s966_s0] sm:$0xff]  ;;  %v398_v34 = vld [vmem:[%s966_s0 + $0x8] sm:$0xff] }
  0x38   : > { %v499_v35 = vld [vmem:[%s893_s25 + $0x78] sm:$0xff]  ;;  %v498_v36 = vld [vmem:[%s893_s25 + $0x70] sm:$0xff]  ;;  %v497_v37 = vld [vmem:[%s893_s25 + $0x68] sm:$0xff] }
  0x39   : > { %422 = vmatpush.msra.mxu0 %v411_v20  ;;  %666 = vmatpush.msra.mxu2 %v411_v20  ;;  %v496_v38 = vld [vmem:[%s893_s25 + $0x60] sm:$0xff]  ;;  %v495_v39 = vld [vmem:[%s893_s25 + $0x58] sm:$0xff]  ;;  %v494_v40 = vld [vmem:[%s893_s25 + $0x50] sm:$0xff] }
  0x3a   : > { %500 = vmatpush.msra.mxu1 %v499_v35  ;;  %679 = vmatpush.msra.mxu3 %v499_v35  ;;  %v493_v41 = vld [vmem:[%s893_s25 + $0x48] sm:$0xff]  ;;  %v492_v42 = vld [vmem:[%s893_s25 + $0x40] sm:$0xff]  ;;  %v491_v43 = vld [vmem:[%s893_s25 + $0x38] sm:$0xff] }
  0x3b   : > { %423 = vmatpush.msra.mxu0 %v410_v21  ;;  %667 = vmatpush.msra.mxu2 %v410_v21  ;;  %v490_v44 = vld [vmem:[%s893_s25 + $0x30] sm:$0xff]  ;;  %v489_v45 = vld [vmem:[%s893_s25 + $0x28] sm:$0xff]  ;;  %v488_v46 = vld [vmem:[%s893_s25 + $0x20] sm:$0xff] }
  0x3c   : > { %501 = vmatpush.msra.mxu1 %v498_v36  ;;  %680 = vmatpush.msra.mxu3 %v498_v36  ;;  %v487_v47 = vld [vmem:[%s893_s25 + $0x18] sm:$0xff]  ;;  %v486_v48 = vld [vmem:[%s893_s25 + $0x10] sm:$0xff]  ;;  %v485_v49 = vld [vmem:[%s893_s25 + $0x8] sm:$0xff] }
  0x3d   : > { %424 = vmatpush.msra.mxu0 %v409_v22  ;;  %668 = vmatpush.msra.mxu2 %v409_v22  ;;  %v736_v50 = vld [vmem:[%s378_s15] ss:$0 sm:$0xff] }
  0x3e   : > { %502 = vmatpush.msra.mxu1 %v497_v37  ;;  %681 = vmatpush.msra.mxu3 %v497_v37  ;;  %v484_v51 = vld [vmem:[%s893_s25] sm:$0xff] }
  0x3f   : > { %425 = vmatpush.msra.mxu0 %v408_v23  ;;  %669 = vmatpush.msra.mxu2 %v408_v23  ;;  %v482_v20 = vld [vmem:[#allocation2] sm:$0xff]  ;;  %v483_v23 = vld [vmem:[#allocation2 + $0x8] sm:$0xff] }
  0x40   : > { %503 = vmatpush.msra.mxu1 %v496_v38  ;;  %682 = vmatpush.msra.mxu3 %v496_v38 }
  0x41   : > { %426 = vmatpush.msra.mxu0 %v407_v24  ;;  %670 = vmatpush.msra.mxu2 %v407_v24 }
  0x42   : > { %504 = vmatpush.msra.mxu1 %v495_v39  ;;  %683 = vmatpush.msra.mxu3 %v495_v39 }
  0x43   : > { %427 = vmatpush.msra.mxu0 %v406_v25  ;;  %671 = vmatpush.msra.mxu2 %v406_v25 }
  0x44   : > { %505 = vmatpush.msra.mxu1 %v494_v40  ;;  %684 = vmatpush.msra.mxu3 %v494_v40 }
  0x45   : > { %428 = vmatpush.msra.mxu0 %v405_v26  ;;  %672 = vmatpush.msra.mxu2 %v405_v26 }
  0x46   : > { %506 = vmatpush.msra.mxu1 %v493_v41  ;;  %685 = vmatpush.msra.mxu3 %v493_v41 }
  0x47   : > { %429 = vmatpush.msra.mxu0 %v404_v27  ;;  %673 = vmatpush.msra.mxu2 %v404_v27 }
  0x48   : > { %507 = vmatpush.msra.mxu1 %v492_v42  ;;  %686 = vmatpush.msra.mxu3 %v492_v42 }
  0x49   : > { %430 = vmatpush.msra.mxu0 %v403_v28  ;;  %674 = vmatpush.msra.mxu2 %v403_v28 }
  0x4a   : > { %508 = vmatpush.msra.mxu1 %v491_v43  ;;  %687 = vmatpush.msra.mxu3 %v491_v43 }
  0x4b   : > { %431 = vmatpush.msra.mxu0 %v402_v29  ;;  %675 = vmatpush.msra.mxu2 %v402_v29 }
  0x4c   : > { %509 = vmatpush.msra.mxu1 %v490_v44  ;;  %688 = vmatpush.msra.mxu3 %v490_v44 }
  0x4d   : > { %432 = vmatpush.msra.mxu0 %v401_v30  ;;  %676 = vmatpush.msra.mxu2 %v401_v30 }
  0x4e   : > { %510 = vmatpush.msra.mxu1 %v489_v45  ;;  %689 = vmatpush.msra.mxu3 %v489_v45 }
  0x4f   : > { %433 = vmatpush.msra.mxu0 %v400_v31  ;;  %677 = vmatpush.msra.mxu2 %v400_v31 }
  0x50   : > { %511 = vmatpush.msra.mxu1 %v488_v46  ;;  %690 = vmatpush.msra.mxu3 %v488_v46 }
  0x51   : > { %434 = vmatpush.msra.mxu0 %v399_v32  ;;  %678 = vmatpush.msra.mxu2 %v399_v32 }
  0x52   : > { %435 = vmatmul.f32.vlgmr.msra.gmra.mxu0 %v397_v33  ;;  %438 = vmatmul.f32.vlgmr.msra.gmra.mxu2 %v398_v34 }
  0x53   : > { %512 = vmatpush.msra.mxu1 %v487_v47  ;;  %691 = vmatpush.msra.mxu3 %v487_v47 }
  0x55   : > { %513 = vmatpush.msra.mxu1 %v486_v48  ;;  %692 = vmatpush.msra.mxu3 %v486_v48 }
  0x57   : > { %514 = vmatpush.msra.mxu1 %v485_v49  ;;  %693 = vmatpush.msra.mxu3 %v485_v49 }
  0x59   : > { %515 = vmatpush.msra.mxu1 %v484_v51  ;;  %694 = vmatpush.msra.mxu3 %v484_v51 }
  0xcf   : > { %v436_v52 = vpop.f32.mrf.mxu0 }
  0xd0   : > { %v437_v53 = vadd.f32 %v736_v50, %v436_v52 }
  0xd2   : > { %v656_v54 = vmul.f32 -1.442695, %v437_v53 }
  0xd4   : > { %737 = vpow2.f32 %v656_v54 }
  0xd5   : > { %v439_v55 = vpop.f32.mrf.mxu2 }
  0xd6   : > { %v440_v56 = vadd.f32 %v736_v50, %v439_v55 }
  0xd8   : > { %v657_v57 = vmul.f32 -1.442695, %v440_v56 }
  0xda   : > { %v738_v58 = vpop.eup %737  ;;  %739 = vpow2.f32 %v657_v57 }
  0xdb   : > { %v448_v59 = vadd.f32 1.0, %v738_v58 }
  0xdd   : > { %741 = vrcp.f32 %v448_v59  ;;  %v461_v0 = vand.u32 2147483648, %v448_v59  ;;  %vm455_vm0 = vweird.f32 %v448_v59  ;;  %v459_v2 = vand.u32 2147483647, %v448_v59 }
  0xdf   : > { %v462_v5 = vor.u32 1.1754944e-38, %v461_v0  ;;  %vm460_vm3 = vcmp.eq.f32.partialorder %v459_v2, 8.507059e+37 }
  0xe0   : > { %v740_v60 = vpop.eup %739 }
  0xe1   : > { %v449_v61 = vadd.f32 1.0, %v740_v60 }
  0xe3   : > { %v742_v62 = vpop.eup %741  ;;  %743 = vrcp.f32 %v449_v61  ;;  %v476_v11 = vand.u32 2147483648, %v449_v61  ;;  %v474_v14 = vand.u32 2147483647, %v449_v61  ;;  %vm470_vm5 = vweird.f32 %v449_v61 }
  0xe4   : > { %v451_v63 = vmul.f32 %v742_v62, %v448_v59  ;;  %vm456_vm1 = vweird.f32 %v742_v62 }
  0xe5   : > { %vm457_vm2 = vmor %vm455_vm0, %vm456_vm1  ;;  %v477_v16 = vor.u32 1.1754944e-38, %v476_v11  ;;  %vm475_vm7 = vcmp.eq.f32.partialorder %v474_v14, 8.507059e+37 }
  0xe6   : > { %v452_v1 = vsub.f32 1.0, %v451_v63 }
  0xe8   : > { %v453_v3 = vmul.f32 %v742_v62, %v452_v1 }
  0xe9   : > { %v744_v4 = vpop.eup %743 }
  0xea   : > { %v454_v6 = vadd.f32 %v742_v62, %v453_v3  ;;  %v466_v7 = vmul.f32 %v744_v4, %v449_v61  ;;  %vm471_vm4 = vweird.f32 %v744_v4 }
  0xeb   : > { %vm472_vm6 = vmor %vm470_vm5, %vm471_vm4 }
  0xec   : > { %v458_v8 = vsel %vm457_vm2, %v742_v62, %v454_v6  ;;  %v467_v9 = vsub.f32 1.0, %v466_v7 }
  0xed   : > { %v463_v10 = vsel %vm460_vm3, %v462_v5, %v458_v8 }
  0xee   : > { %v480_v12 = vmul.f32 %v463_v10, %v437_v53  ;;  %v468_v13 = vmul.f32 %v744_v4, %v467_v9 }
  0xf0   : > { %516 = vmatmul.f32.vlgmr.msra.gmra.mxu1 %v480_v12  ;;  %v469_v15 = vadd.f32 %v744_v4, %v468_v13 }
  0xf2   : > { %v473_v17 = vsel %vm472_vm6, %v744_v4, %v469_v15 }
  0xf3   : > { %v478_v18 = vsel %vm475_vm7, %v477_v16, %v473_v17 }
  0xf4   : > { %v481_v19 = vmul.f32 %v478_v18, %v440_v56 }
  0xf6   : > { %519 = vmatmul.f32.vlgmr.msra.gmra.mxu3 %v481_v19 }
 0x16d   : > { %v517_v21 = vpop.f32.mrf.mxu1 }
 0x16e   : > { %v523_v22 = vadd.f32 %v517_v21, %v482_v20 }
 0x170   : > { %525 = vst [vmem:[#allocation2] sm:$0xff] %v523_v22 }
 0x178   : > { %530 = sbr.rel (%p658_p12) target bundleno = 391 (0x187), region = 86 }
 0x179   : > { %v520_v24 = vpop.f32.mrf.mxu3 }
 0x17a   : > { %v524_v25 = vadd.f32 %v520_v24, %v483_v23 }
 0x17c   : > { %526 = vst [vmem:[#allocation2 + $0x8] sm:$0xff] %v524_v25 }
 0x17d   : > { %v531_v26 = vld [vmem:[#allocation2] sm:$0xff] }
 0x17e   : > { %v745_v27 = vld [vmem:[%s970_s4] ss:$0 sm:$0xff] }
 0x17f   : > { %v537_v29 = vadd.f32 %v745_v27, %v531_v26 }
 0x181   : > { %539 = vst [vmem:[%s971_s5] sm:$0xff] %v537_v29 }
 0x183   : > { %v532_v28 = vld [vmem:[#allocation2 + $0x8] sm:$0xff] }
 0x184   : > { %v538_v30 = vadd.f32 %v745_v27, %v532_v28 }
 0x186   : > { %540 = vst [vmem:[%s971_s5 + $0x8] sm:$0xff] %v538_v30 }
 0x187 PF: > { %s15_s22 = sadd.s32 1, %s784_s22   ;;  %s972_s18 = smov %s772_s19 }
 0x188   : > { %p12_p13 = scmp.ge.s32.totalorder %s15_s22, 5   ;;  %s973_s19 = smov %s852_s26 }
 0x189   : > { %s974_s20 = smov %s780_s21  ;;  %s975_s21 = smov %s977_s23 }
 0x18a   :  { %14 = sbr.rel (!%p12_p13) target bundleno = 3 (0x3), region = 130 }

</bundles_post_ra>
